<compile_context>
chip_gen: v7x
topology: tpu7x:2x2x1
jax: 0.10.0
libtpu: 0.0.40
codegen_flags: <defaults>
</compile_context>

<pallas_src>
import math

import numpy as np
import jax
import jax.numpy as jnp
from jax.experimental import pallas as pl
from jax.experimental.pallas import tpu as pltpu


# ----------------------------- Pallas kernels --------------------------------

def _ffn_resident_kernel(x_ref, w1_ref, b1_ref, w2_ref, b2_ref, o_ref):
    # Whole FFN for one row tile; weights are VMEM-resident (constant block index).
    h = jnp.dot(x_ref[...], w1_ref[...], preferred_element_type=jnp.float32)
    h = jnp.maximum(h + b1_ref[...], 0.0)
    # NOTE: dropout in the reference module is identity in eval mode.
    o_ref[...] = (
        jnp.dot(h.astype(w2_ref.dtype), w2_ref[...], preferred_element_type=jnp.float32)
        + b2_ref[...]
    ).astype(o_ref.dtype)


def _ffn_streaming_kernel(x_ref, w1_ref, b1_ref, w2_ref, b2_ref, o_ref):
    # Reduction over dim_ff blocks; accumulate directly into the (resident) f32 output block.
    f = pl.program_id(1)

    h = jnp.dot(x_ref[...], w1_ref[...], preferred_element_type=jnp.float32)
    h = jnp.maximum(h + b1_ref[...], 0.0)
    part = jnp.dot(h.astype(w2_ref.dtype), w2_ref[...], preferred_element_type=jnp.float32)

    @pl.when(f == 0)
    def _():
        o_ref[...] = part + b2_ref[...]      # init with bias -> no zero-fill / finalize pass

    @pl.when(f != 0)
    def _():
        o_ref[...] = o_ref[...] + part


# ----------------------------- wrapper ---------------------------------------

def position_wise_feed_forward(x, w1, b1, w2, b2, *, tm=256, tf=512,
                               weight_resident_bytes=16 * 2**20):
    """x: (..., dim_model); w1: (dim_model, dim_ff); w2: (dim_ff, dim_model)."""
    *lead, D = x.shape
    Dff = w1.shape[1]
    assert w1.shape == (D, Dff) and w2.shape == (Dff, D)
    assert b1.shape == (Dff,) and b2.shape == (D,)

    # bf16 MXU operands; cast activations BEFORE padding to halve pre-kernel traffic.
    x2d = x.reshape(-1, D).astype(jnp.bfloat16)
    M = x2d.shape[0]

    # Row tile: multiple of 8 (sublane); clamp for small M, and keep >= 2 row tiles when
    # possible so the "parallel" axis can feed both v7x TensorCores.
    tm = max(8, min(tm, int(pl.cdiv(M, 8)) * 8))
    if M > 8 and int(pl.cdiv(M, tm)) < 2:
        tm = max(8, int(pl.cdiv(int(pl.cdiv(M, 2)), 8)) * 8)
    Mp = int(pl.cdiv(M, tm)) * tm
    if Mp != M:
        x2d = jnp.pad(x2d, ((0, Mp - M), (0, 0)))
    n_m = Mp // tm

    w1b = w1.astype(jnp.bfloat16)
    w2b = w2.astype(jnp.bfloat16)
    b1f = b1.reshape(1, Dff).astype(jnp.float32)
    b2f = b2.reshape(1, D).astype(jnp.float32)

    weight_bytes = 2 * D * Dff * 2  # both weight matrices, bf16
    resident = weight_bytes <= weight_resident_bytes

    if resident:
        grid = (n_m,)
        in_specs = [
            pl.BlockSpec((tm, D), lambda i: (i, 0)),     # x row tile (pipelined)
            pl.BlockSpec((D, Dff), lambda i: (0, 0)),    # W1: full, DMA'd once
            pl.BlockSpec((1, Dff), lambda i: (0, 0)),    # b1: full
            pl.BlockSpec((Dff, D), lambda i: (0, 0)),    # W2: full, DMA'd once
            pl.BlockSpec((1, D), lambda i: (0, 0)),      # b2: full
        ]
        out_specs = pl.BlockSpec((tm, D), lambda i: (i, 0))
        kernel = _ffn_resident_kernel
        dim_sem = ("parallel",)
        est = (2 * tm * D * 2            # x double-buffered (bf16)
               + 2 * tm * D * 4          # out double-buffered (f32)
               + 2 * weight_bytes        # weights (allow double-buffer allocation)
               + 2 * (Dff * 4 + D * 4)   # biases
               + tm * Dff * 4)           # hidden activations (f32)
    else:
        # Streaming reduction over dim_ff; pad dim_ff up to a multiple of a 128-aligned tf
        # so weight blocks stay bounded (zero-padded hidden units contribute nothing).
        tf = max(128, (min(tf, Dff) // 128) * 128)
        Dffp = int(pl.cdiv(Dff, tf)) * tf
        if Dffp != Dff:
            w1b = jnp.pad(w1b, ((0, 0), (0, Dffp - Dff)))
            b1f = jnp.pad(b1f, ((0, 0), (0, Dffp - Dff)))
            w2b = jnp.pad(w2b, ((0, Dffp - Dff), (0, 0)))
        grid = (n_m, Dffp // tf)
        in_specs = [
            pl.BlockSpec((tm, D), lambda i, f: (i, 0)),
            pl.BlockSpec((D, tf), lambda i, f: (0, f)),
            pl.BlockSpec((1, tf), lambda i, f: (0, f)),
            pl.BlockSpec((tf, D), lambda i, f: (f, 0)),
            pl.BlockSpec((1, D), lambda i, f: (0, 0)),
        ]
        out_specs = pl.BlockSpec((tm, D), lambda i, f: (i, 0))
        kernel = _ffn_streaming_kernel
        dim_sem = ("parallel", "arbitrary")
        est = (2 * tm * D * 2
               + 2 * tm * D * 4
               + 2 * (D * tf * 2 + tf * D * 2)
               + 2 * (tf * 4 + D * 4)
               + tm * tf * 4)

    # Explicit VMEM limit: at least the 32 MiB scoped default, capped below v7x's 64 MiB.
    vmem_limit = int(min(max(32 * 2**20, 2 * est), 56 * 2**20))

    out = pl.pallas_call(
        kernel,
        out_shape=jax.ShapeDtypeStruct((Mp, D), jnp.float32),
        grid_spec=pltpu.PrefetchScalarGridSpec(
            num_scalar_prefetch=0,
            grid=grid,
            in_specs=in_specs,
            out_specs=out_specs,
        ),
        compiler_params=pltpu.CompilerParams(
            dimension_semantics=dim_sem,
            vmem_limit_bytes=vmem_limit,
        ),
    )(x2d, w1b, b1f, w2b, b2f)

    return out[:M].reshape(*lead, D)


# ----------------------------- main -------------------------------------------

if __name__ == "__main__":
    B, S = 2, 64
    dim_model, dim_ff = 128, 512

    key = jax.random.PRNGKey(0)
    kx, k1, kb1, k2, kb2 = jax.random.split(key, 5)

    x = jax.random.normal(kx, (B, S, dim_model), jnp.float32)

    # nn.Linear-style init (weights stored as (in, out) so x @ W matches torch's x @ W.T)
    lim1 = 1.0 / math.sqrt(dim_model)
    w1 = jax.random.uniform(k1, (dim_model, dim_ff), jnp.float32, -lim1, lim1)
    b1 = jax.random.uniform(kb1, (dim_ff,), jnp.float32, -lim1, lim1)
    lim2 = 1.0 / math.sqrt(dim_ff)
    w2 = jax.random.uniform(k2, (dim_ff, dim_model), jnp.float32, -lim2, lim2)
    b2 = jax.random.uniform(kb2, (dim_model,), jnp.float32, -lim2, lim2)

    out = position_wise_feed_forward(x, w1, b1, w2, b2)
    out = jax.block_until_ready(out)

    # pure-JAX reference with the same bf16 MXU casting (dropout == identity in eval mode)
    xb = x.reshape(-1, dim_model).astype(jnp.bfloat16)
    h_ref = jnp.maximum(
        jnp.dot(xb, w1.astype(jnp.bfloat16), preferred_element_type=jnp.float32) + b1, 0.0)
    ref = (jnp.dot(h_ref.astype(jnp.bfloat16), w2.astype(jnp.bfloat16),
                   preferred_element_type=jnp.float32) + b2).reshape(B, S, dim_model)

    assert out.shape == (B, S, dim_model), out.shape
    assert bool(jnp.all(jnp.isfinite(out)))
    np.testing.assert_allclose(np.asarray(out), np.asarray(ref), rtol=2e-2, atol=2e-2)

    # TODO(synk): training-mode dropout (random masking) is not implemented; eval semantics only.
    print("KERNEL_OK")
</pallas_src>

<mosaic_0001>
module attributes {stable_mosaic.version = 11 : i64} {
  func.func @_ffn_resident_kernel(%arg0: i32, %arg1: memref<64x128xbf16, #tpu.memory_space<vmem>>, %arg2: memref<128x512xbf16, #tpu.memory_space<vmem>>, %arg3: memref<1x512xf32, #tpu.memory_space<vmem>>, %arg4: memref<512x128xbf16, #tpu.memory_space<vmem>>, %arg5: memref<1x128xf32, #tpu.memory_space<vmem>>, %arg6: memref<64x128xf32, #tpu.memory_space<vmem>>) attributes {dimension_semantics = [#tpu.dimension_semantics<parallel>], iteration_bounds = array<i64: 2>, scalar_prefetch = 0 : i64, scratch_operands = 0 : i64, tpu.core_type = #tpu.core_type<tc>, window_params = [{transform_indices = @transform_0, window_bounds = array<i64: 64, 128>}, {pipeline_mode = #tpu.pipeline_mode<synchronous>, transform_indices = @transform_1, window_bounds = array<i64: 128, 512>}, {pipeline_mode = #tpu.pipeline_mode<synchronous>, transform_indices = @transform_2, window_bounds = array<i64: 1, 512>}, {pipeline_mode = #tpu.pipeline_mode<synchronous>, transform_indices = @transform_3, window_bounds = array<i64: 512, 128>}, {pipeline_mode = #tpu.pipeline_mode<synchronous>, transform_indices = @transform_4, window_bounds = array<i64: 1, 128>}, {transform_indices = @transform_5, window_bounds = array<i64: 64, 128>}]} {
    %c0 = arith.constant 0 : index
    %c0_0 = arith.constant 0 : index
    %0 = vector.load %arg1[%c0, %c0_0] : memref<64x128xbf16, #tpu.memory_space<vmem>>, vector<64x128xbf16>
    %c0_1 = arith.constant 0 : index
    %c0_2 = arith.constant 0 : index
    %1 = vector.load %arg2[%c0_1, %c0_2] : memref<128x512xbf16, #tpu.memory_space<vmem>>, vector<128x512xbf16>
    %cst = arith.constant dense<0.000000e+00> : vector<64x512xf32>
    %2 = tpu.matmul %0, %1, %cst {dimension_numbers = #tpu.dot_dimension_numbers<[1], [0], [0], [1], [0, 0, 1, 1], [], []>} : vector<64x128xbf16>, vector<128x512xbf16>, vector<64x512xf32> -> vector<64x512xf32>
    %c0_3 = arith.constant 0 : index
    %c0_4 = arith.constant 0 : index
    %3 = vector.load %arg3[%c0_3, %c0_4] : memref<1x512xf32, #tpu.memory_space<vmem>>, vector<1x512xf32>
    %4 = vector.broadcast %3 : vector<1x512xf32> to vector<64x512xf32>
    %5 = arith.addf %2, %4 : vector<64x512xf32>
    %cst_5 = arith.constant 0.000000e+00 : f32
    %6 = vector.broadcast %cst_5 : f32 to vector<64x512xf32>
    %7 = arith.maximumf %5, %6 : vector<64x512xf32>
    %8 = arith.truncf %7 : vector<64x512xf32> to vector<64x512xbf16>
    %c0_6 = arith.constant 0 : index
    %c0_7 = arith.constant 0 : index
    %9 = vector.load %arg4[%c0_6, %c0_7] : memref<512x128xbf16, #tpu.memory_space<vmem>>, vector<512x128xbf16>
    %cst_8 = arith.constant dense<0.000000e+00> : vector<64x128xf32>
    %10 = tpu.matmul %8, %9, %cst_8 {dimension_numbers = #tpu.dot_dimension_numbers<[1], [0], [0], [1], [0, 0, 1, 1], [], []>} : vector<64x512xbf16>, vector<512x128xbf16>, vector<64x128xf32> -> vector<64x128xf32>
    %c0_9 = arith.constant 0 : index
    %c0_10 = arith.constant 0 : index
    %11 = vector.load %arg5[%c0_9, %c0_10] : memref<1x128xf32, #tpu.memory_space<vmem>>, vector<1x128xf32>
    %12 = vector.broadcast %11 : vector<1x128xf32> to vector<64x128xf32>
    %13 = arith.addf %10, %12 : vector<64x128xf32>
    %c0_11 = arith.constant 0 : index
    %c0_12 = arith.constant 0 : index
    %14 = vector.load %arg6[%c0_11, %c0_12] : memref<64x128xf32, #tpu.memory_space<vmem>>, vector<64x128xf32>
    tpu.vector_store %arg6[%c0_11, %c0_12], %13 {strides = array<i32>} : memref<64x128xf32, #tpu.memory_space<vmem>>, vector<64x128xf32>,
    return
  }
  func.func @transform_0(%arg0: i32) -> (i32, i32) {
    %c0_i32 = arith.constant 0 : i32
    %c0_i32_0 = arith.constant 0 : i32
    return %arg0, %c0_i32 : i32, i32
  }
  func.func @transform_1(%arg0: i32) -> (i32, i32) {
    %c0_i32 = arith.constant 0 : i32
    %c0_i32_0 = arith.constant 0 : i32
    %c0_i32_1 = arith.constant 0 : i32
    return %c0_i32, %c0_i32_0 : i32, i32
  }
  func.func @transform_2(%arg0: i32) -> (i32, i32) {
    %c0_i32 = arith.constant 0 : i32
    %c0_i32_0 = arith.constant 0 : i32
    %c0_i32_1 = arith.constant 0 : i32
    return %c0_i32, %c0_i32_0 : i32, i32
  }
  func.func @transform_3(%arg0: i32) -> (i32, i32) {
    %c0_i32 = arith.constant 0 : i32
    %c0_i32_0 = arith.constant 0 : i32
    %c0_i32_1 = arith.constant 0 : i32
    return %c0_i32, %c0_i32_0 : i32, i32
  }
  func.func @transform_4(%arg0: i32) -> (i32, i32) {
    %c0_i32 = arith.constant 0 : i32
    %c0_i32_0 = arith.constant 0 : i32
    %c0_i32_1 = arith.constant 0 : i32
    return %c0_i32, %c0_i32_0 : i32, i32
  }
  func.func @transform_5(%arg0: i32) -> (i32, i32) {
    %c0_i32 = arith.constant 0 : i32
    %c0_i32_0 = arith.constant 0 : i32
    return %arg0, %c0_i32 : i32, i32
  }
}

</mosaic_0001>

<bundles_post_ra>
// kernel: tpu_custom_call.1
= control target key start
LH: loop header
LB: loop body
LE: loop exit
PB: predicated region body
PF: predicated region fallthrough
CT: control target
= control target key end

     0   :  { %10 = vsyncpa [#allocation3], 0  ;;  %s2070_s0 = inlined_call_operand.hbm [shape: bf16[128,128], index: 0, kind: input, shape index: {}]   ;;  %s2071_s1 = inlined_call_operand.hbm [shape: bf16[128,512], index: 1, kind: input, shape index: {}]   ;;  %s2072_s2 = inlined_call_operand.vmem [shape: f32[1,512], index: 2, kind: input, shape index: {}]   ;;  %s2073_s3 = inlined_call_operand.hbm [shape: bf16[512,128], index: 3, kind: input, shape index: {}]   ;;  %s2074_s4 = inlined_call_operand.vmem [shape: f32[1,128], index: 4, kind: input, shape index: {}]   ;;  %s2075_s5 = inlined_call_operand.hbm [shape: f32[128,128], index: 5, kind: output, shape index: {}]  }
   0x1   :  { %12 = vsyncpa [#allocation3 + $0x1], 0 }
   0x2   :  { %13 = vsyncpa [#allocation6], 0 }
   0x3   :  { %14 = vsyncpa [#allocation4], 0 }
   0x4   :  { %16 = vsyncpa [#allocation4 + $0x1], 0  ;;  %s1748_s18 = smov 0   ;;  %s1750_s19 = smov 0  }
   0x5   :  { %s1752_s20 = smov 0   ;;  %s1754_s21 = smov 0  }
   0x6 LB: > { %s1769_s22 = sadd.s32 4294967295, %s1705_s21   ;;  %s1222_s23 = sadd.s32 4294967294, %s1705_s21   ;;  %s1705_s21 = sphi %s1754_s21, %s2095_s21   ;;  %s1701_s20 = sphi %s1752_s20, %s2094_s20   ;;  %s1697_s19 = sphi %s1750_s19, %s2093_s19   ;;  %s1693_s18 = sphi %s1748_s18, %s2092_s18  }
   0x7   : > { %p42_p0 = scmp.ne.s32.totalorder %s1697_s19, %s1693_s18  ;;  %p2076_p1 = scmp.eq.s32.totalorder %s1769_s22, 0 }
   0x8   : > { %p156_p3 = scmp.eq.s32.totalorder %s1222_s23, 1  ;;  %p1223_p5 = scmp.ge.s32.totalorder %s1705_s21, 1 }
   0x9   : > { %p1778_p4 = por %p2076_p1, %p42_p0  ;;  %p163_p7 = scmp.lt.s32.totalorder %s1705_s21, 3 }
   0xa   : > { %p1783_p6 = por %p156_p3, %p42_p0  ;;  %s1707_s27 = smov [#allocation5]  }
   0xb   : > { %s2079_s24 = scalar_select %p1778_p4, 1, 0 }
   0xc   : > { %s2080_s25 = scalar_select %p1783_p6, 1, 0 }
   0xd   : > { %p1788_p8 = pnand %p1223_p5, %p163_p7  ;;  %s175_s28 = sshll.u32 %s1707_s27, 4  ;;  %s1792_s28 = int_to_ptr.vmem [resolvable:$true] %s175_s28 }
   0xe   : > { %s1708_s30 = smov [#allocation7]   ;;  %s1549_s9 = scalar_lea.hbm %s2071_s1, 4096 }
   0xf   : > { %p1403_p9 = pneg %p1788_p8  ;;  %s191_s6 = sshll.u32 %s1708_s30, 4  ;;  %s1803_s6 = int_to_ptr.vmem [resolvable:$true] %s191_s6 }
  0x10   : > { %p1550_p12 = scmp.ne.s32.totalorder %s2071_s1, %s1549_s9  ;;  %p1556_p5 = scmp.lt.u32.totalorder %s1549_s9, %s2071_s1 }
  0x11   : > { %p1799_p11 = pnand %p1403_p9, %p2076_p1 }
  0x13   : > { %p1551_p13 = pneg %p1799_p11 }
  0x15   : > { %p1552_p0 = pnand %p1551_p13, %p1550_p12 }
  0x17   : > { %p1553_p3 = pneg %p1552_p0 }
  0x19   : > { %p1558_p7 = pnand %p1556_p5, %p1553_p3 }
  0x1b   : > { %1561 = shalt.err (!%p1558_p7)
}
  0x1c   : > { %s1562_s14 = scalar_lea.vmem %s1792_s28, 4096  ;;  %p1570_p2 = scmp.lt.s32.totalorder %s1792_s28, %s1792_s28 }
  0x1d   : > { %p1563_p9 = scmp.ne.s32.totalorder %s1792_s28, %s1562_s14  ;;  %p1571_p12 = scmp.lt.s32.totalorder %s1562_s14, %s1562_s14 }
  0x1f   : > { %p1565_p10 = pnand %p1563_p9, %p1551_p13  ;;  %p1572_p0 = por %p1571_p12, %p1570_p2 }
  0x21   : > { %p1566_p1 = pneg %p1565_p10 }
  0x23   : > { %p1573_p6 = pnand %p1572_p0, %p1566_p1 }
  0x25   : > { %1576 = shalt.err (!%p1573_p6)
}
  0x26   : > { %s1709_s15 = smov 256   ;;  %s1710_s16 = smov 16  }
  0x27   : > { %1406 = dma.hbm_to_vmem [thread:$0]  (!%p1799_p11), %s2071_s1, 4096, %s1792_s28, [#allocation6], %s1709_s15, %s1709_s15, %s1710_s16  }
  0x28   : > { %s1577_s7 = scalar_lea.hbm %s2073_s3, 4096 }
  0x29   : > { %p1578_p2 = scmp.ne.s32.totalorder %s2073_s3, %s1577_s7  ;;  %p1584_p10 = scmp.lt.u32.totalorder %s1577_s7, %s2073_s3 }
  0x2b   : > { %p1580_p1 = pnand %p1578_p2, %p1551_p13 }
  0x2d   : > { %p1581_p6 = pneg %p1580_p1 }
  0x2f   : > { %p1586_p3 = pnand %p1584_p10, %p1581_p6 }
  0x31   : > { %1589 = shalt.err (!%p1586_p3)
}
  0x32   : > { %s1590_s28 = scalar_lea.vmem %s1803_s6, 4096  ;;  %p1598_p12 = scmp.lt.s32.totalorder %s1803_s6, %s1803_s6 }
  0x33   : > { %p1591_p5 = scmp.ne.s32.totalorder %s1803_s6, %s1590_s28  ;;  %p1599_p0 = scmp.lt.s32.totalorder %s1590_s28, %s1590_s28 }
  0x35   : > { %p1593_p7 = pnand %p1591_p5, %p1551_p13  ;;  %p1600_p2 = por %p1599_p0, %p1598_p12 }
  0x37   : > { %p1594_p9 = pneg %p1593_p7 }
  0x39   : > { %p1601_p1 = pnand %p1600_p2, %p1594_p9 }
  0x3b   : > { %1604 = shalt.err (!%p1601_p1)
}
  0x3c   : > { %s1711_s12 = smov 64   ;;  %s1712_s13 = smov 4  }
  0x3d   : > { %1409 = dma.hbm_to_vmem [thread:$0]  (!%p1799_p11), %s2073_s3, 4096, %s1803_s6, [#allocation6], %s1711_s12, %s1711_s12, %s1712_s13  }
  0x3e   : > { %s1861_s16 = sadd.s32 1, %s1705_s21   ;;  %s29_s23 = sadd.s32 1, %s1701_s20 }
  0x3f   : > { %s26_s17 = ssub.s32 %s1705_s21, %s1861_s16  ;;  %p36_p6 = scmp.ne.s32.totalorder %s1701_s20, %s1697_s19 }
  0x40   : > { %p27_p13 = scmp.eq.s32.totalorder %s26_s17, 0  ;;  %p37_p10 = scmp.eq.s32.totalorder %s1705_s21, 0 }
  0x41   : > { %p2083_p5 = scmp.eq.s32.totalorder %s1769_s22, 1  ;;  %p1420_p9 = scmp.lt.s32.totalorder %s1705_s21, 2 }
  0x42   : > { %s1870_s27 = scalar_select %p27_p13, %s1701_s20, %s29_s23  }
  0x43   : > { %p38_p3 = por %p37_p10, %p36_p6  ;;  %p1874_p7 = por %p2083_p5, %p36_p6 }
  0x44   : > { %s208_s30 = sand.u32 1, %s1701_s20   ;;  %s1309_s6 = sshll.u32 %s1705_s21, 9 }
  0x45   : > { %s2084_s29 = scalar_select %p1874_p7, 1, 0 }
  0x46   : > { %s1227_s7 = sshll.u32 %s208_s30, 5  ;;  %s1884_s10 = scalar_lea.hbm %s2070_s0, %s1309_s6 }
  0x47   : > { %s212_s11 = scalar_lea.vmem [#allocation2], %s1227_s7  ;;  %p1888_p11 = pnand %p1420_p9, %p38_p3 }
  0x48   : > { %s219_s28 = sshll.u32 %s212_s11, 4  ;;  %s1892_s15 = scalar_lea.sflag [#allocation3], %s208_s30  ;;  %s1886_s28 = int_to_ptr.vmem [resolvable:$true] %s219_s28 }
  0x49   : > { %s1605_s17 = scalar_lea.hbm %s1884_s10, 512  ;;  %p1607_p0 = pneg %p1888_p11 }
  0x4a   : > { %p1606_p12 = scmp.ne.s32.totalorder %s1884_s10, %s1605_s17  ;;  %s1610_s6 = scalar_lea.hbm %s2070_s0, 1024 }
  0x4b   : > { %p1611_p13 = scmp.lt.u32.totalorder %s1884_s10, %s2070_s0  ;;  %p1612_p6 = scmp.lt.u32.totalorder %s1610_s6, %s1605_s17 }
  0x4c   : > { %p1608_p2 = pnand %p1607_p0, %p1606_p12  ;;  %p1614_p3 = scmp.lt.u32.totalorder %s1605_s17, %s1884_s10 }
  0x4d   : > { %p1613_p10 = por %p1612_p6, %p1611_p13 }
  0x4e   : > { %p1609_p1 = pneg %p1608_p2 }
  0x4f   : > { %p1615_p5 = por %p1614_p3, %p1613_p10 }
  0x51   : > { %p1616_p9 = pnand %p1615_p5, %p1609_p1 }
  0x53   : > { %1619 = shalt.err (!%p1616_p9)
}
  0x54   : > { %s1620_s30 = scalar_lea.vmem %s1886_s28, 512  ;;  %s1713_s11 = smov [#allocation2]  }
  0x55   : > { %p1621_p12 = scmp.ne.s32.totalorder %s1886_s28, %s1620_s30  ;;  %s1625_s23 = sshll.u32 %s1713_s11, 4  ;;  %s1626_s23 = int_to_ptr.vmem [resolvable:$false] %s1625_s23 }
  0x56   : > { %s1627_s7 = scalar_lea.vmem %s1626_s23, 1024  ;;  %p1628_p4 = scmp.lt.s32.totalorder %s1886_s28, %s1626_s23 }
  0x57   : > { %p1623_p2 = pnand %p1621_p12, %p1607_p0  ;;  %p1629_p13 = scmp.lt.s32.totalorder %s1627_s7, %s1620_s30 }
  0x59   : > { %p1624_p7 = pneg %p1623_p2  ;;  %p1630_p6 = por %p1629_p13, %p1628_p4 }
  0x5b   : > { %p1631_p10 = pnand %p1630_p6, %p1624_p7 }
  0x5d   : > { %1634 = shalt.err (!%p1631_p10)
}
  0x5e   : > { %1413 = dma.hbm_to_vmem [thread:$0]  (!%p1888_p11), %s1884_s10, 512, %s1886_s28, %s1892_s15, %s1711_s12, %s1711_s12, %s1712_s13  }
  0x5f   : > { %231 = sbr.rel (%p1788_p8) target bundleno = 622 (0x26e), region = 40  ;;  %s1926_s17 = sand.u32 (!%p1788_p8), 1, %s1697_s19  }
  0x60   : > { %s1231_s6 = sshll.u32 (!%p1788_p8), %s1926_s17, 5  ;;  %s234_s8 = scalar_lea.sflag (!%p1788_p8), [#allocation3], %s1926_s17 }
  0x61   : > { %s1930_s9 = scalar_lea.vmem (!%p1788_p8), [#allocation2], %s1231_s6  ;;  %p2086_p4 = scmp.ne.s32.totalorder (!%p1788_p8), %s2079_s24, 0 }
  0x66   : > { %1680 = dma.done.wait (%p2086_p4), %s234_s8, 512  }
  0x67   : > { %1682 = vsyncadd (%p2086_p4), %s234_s8, 4294966784  ;;  %p2087_p7 = scmp.eq.s32.totalorder %s1769_s22, 0 }
  0x69   : > { %1684 = dma.done.wait (%p2087_p7), [#allocation6], 8192   ;;  %p2088_p8 = pmov %p2087_p7 }
  0x6a   : > { %v1714_v0 = vmov 0   ;;  %v1465_v1 = vld [vmem:[#allocation5 + $0x4] ss:$16 sps:$4 sm:$0xff]   ;;  %v1467_v2 = vld [vmem:[#allocation5 + $0xc] ss:$16 sps:$4 sm:$0xff]   ;;  %s1234_s10 = sshll.u32 %s1926_s17, 6 }
  0x6b   : > { %1686 = vsyncadd (%p2088_p8), [#allocation6], 4294959104  ;;  %553 = vmatprep.mubr.bf16.mxu0 %v1714_v0  ;;  %626 = vmatprep.mubr.bf16.mxu1 %v1714_v0  ;;  %v1469_v3 = vld [vmem:[#allocation5] ss:$16 sps:$4 sm:$0xff]   ;;  %v1470_v4 = vld [vmem:[#allocation5 + $0x8] ss:$16 sps:$4 sm:$0xff]  }
  0x6c   : > { %521 = vmatprep.subr.bf16.mxu0 %v1465_v1  ;;  %594 = vmatprep.subr.bf16.mxu1 %v1467_v2  ;;  %v1471_v5 = vld [vmem:[#allocation5 + $0x24] ss:$16 sps:$4 sm:$0xff]   ;;  %v1473_v6 = vld [vmem:[#allocation5 + $0x2c] ss:$16 sps:$4 sm:$0xff]   ;;  %v1475_v7 = vld [vmem:[#allocation5 + $0x20] ss:$16 sps:$4 sm:$0xff]  }
  0x6d   : > { %522 = vmatpush1.bf16.msra.mxu0 %v1469_v3  ;;  %595 = vmatpush1.bf16.msra.mxu1 %v1470_v4  ;;  %v1476_v8 = vld [vmem:[#allocation5 + $0x28] ss:$16 sps:$4 sm:$0xff]   ;;  %v1477_v9 = vld [vmem:[#allocation5 + $0x44] ss:$16 sps:$4 sm:$0xff]   ;;  %v1479_v10 = vld [vmem:[#allocation5 + $0x4c] ss:$16 sps:$4 sm:$0xff]  }
  0x6e   : > { %523 = vmatprep.subr.bf16.mxu0 %v1471_v5  ;;  %596 = vmatprep.subr.bf16.mxu1 %v1473_v6  ;;  %v1481_v11 = vld [vmem:[#allocation5 + $0x40] ss:$16 sps:$4 sm:$0xff]   ;;  %v1482_v12 = vld [vmem:[#allocation5 + $0x48] ss:$16 sps:$4 sm:$0xff]   ;;  %v1483_v13 = vld [vmem:[#allocation5 + $0x64] ss:$16 sps:$4 sm:$0xff]   ;;  %v317_v5 = vlaneseq }
  0x6f   : > { %v1485_v14 = vld [vmem:[#allocation5 + $0x6c] ss:$16 sps:$4 sm:$0xff]   ;;  %v1487_v15 = vld [vmem:[#allocation5 + $0x60] ss:$16 sps:$4 sm:$0xff]   ;;  %v1488_v16 = vld [vmem:[#allocation5 + $0x68] ss:$16 sps:$4 sm:$0xff]  }
  0x70   : > { %v1489_v17 = vld [vmem:[#allocation5 + $0x84] ss:$16 sps:$4 sm:$0xff]   ;;  %v1491_v18 = vld [vmem:[#allocation5 + $0x8c] ss:$16 sps:$4 sm:$0xff]   ;;  %v1493_v19 = vld [vmem:[#allocation5 + $0x80] ss:$16 sps:$4 sm:$0xff]  }
  0x71   : > { %524 = vmatpush1.bf16.msra.mxu0 %v1475_v7  ;;  %597 = vmatpush1.bf16.msra.mxu1 %v1476_v8  ;;  %v1494_v20 = vld [vmem:[#allocation5 + $0x88] ss:$16 sps:$4 sm:$0xff]   ;;  %v1495_v21 = vld [vmem:[#allocation5 + $0xa4] ss:$16 sps:$4 sm:$0xff]   ;;  %v1497_v22 = vld [vmem:[#allocation5 + $0xac] ss:$16 sps:$4 sm:$0xff]  }
  0x72   : > { %525 = vmatprep.subr.bf16.mxu0 %v1477_v9  ;;  %598 = vmatprep.subr.bf16.mxu1 %v1479_v10  ;;  %v1499_v23 = vld [vmem:[#allocation5 + $0xa0] ss:$16 sps:$4 sm:$0xff]   ;;  %v1500_v24 = vld [vmem:[#allocation5 + $0xa8] ss:$16 sps:$4 sm:$0xff]   ;;  %v1501_v25 = vld [vmem:[#allocation5 + $0xc4] ss:$16 sps:$4 sm:$0xff]  }
  0x73   : > { %v1503_v26 = vld [vmem:[#allocation5 + $0xcc] ss:$16 sps:$4 sm:$0xff]   ;;  %v1505_v27 = vld [vmem:[#allocation5 + $0xc0] ss:$16 sps:$4 sm:$0xff]   ;;  %v1506_v28 = vld [vmem:[#allocation5 + $0xc8] ss:$16 sps:$4 sm:$0xff]  }
  0x74   : > { %v1507_v29 = vld [vmem:[#allocation5 + $0xe4] ss:$16 sps:$4 sm:$0xff]   ;;  %v1509_v30 = vld [vmem:[#allocation5 + $0xec] ss:$16 sps:$4 sm:$0xff]   ;;  %v1511_v31 = vld [vmem:[#allocation5 + $0xe0] ss:$16 sps:$4 sm:$0xff]  }
  0x75   : > { %526 = vmatpush1.bf16.msra.mxu0 %v1481_v11  ;;  %599 = vmatpush1.bf16.msra.mxu1 %v1482_v12  ;;  %v1512_v32 = vld [vmem:[#allocation5 + $0xe8] ss:$16 sps:$4 sm:$0xff]   ;;  %v1517_v33 = vld [vmem:[#allocation7 + $0x40] sm:$0xff]   ;;  %v1525_v43 = vld [vmem:[#allocation7 + $0x50] sm:$0xff]   ;;  %v318_v6 = vshrl.u32 %v317_v5, 7  ;;  %s2003_s28 = scalar_lea.vmem [#allocation8], %s1234_s10 }
  0x76   : > { %527 = vmatprep.subr.bf16.mxu0 %v1483_v13  ;;  %600 = vmatprep.subr.bf16.mxu1 %v1485_v14  ;;  %v1519_v34 = vld [vmem:[#allocation7 + $0xc0] sm:$0xff]   ;;  %v1521_v38 = vld [vmem:[#allocation7 + $0x48] sm:$0xff]   ;;  %v1527_v44 = vld [vmem:[#allocation7 + $0xd0] sm:$0xff]   ;;  %s1130_s14 = sshll.u32 %s2003_s28, 4  ;;  %s1310_s15 = sshll.u32 %s1769_s22, 10  ;;  %s2018_s14 = int_to_ptr.vmem [resolvable:$true] %s1130_s14 }
  0x77   : > { %v1513_v35 = vld [vmem:[%s1930_s9] sm:$0xff]   ;;  %v1523_v39 = vld [vmem:[#allocation7 + $0xc8] sm:$0xff]   ;;  %v1526_v45 = vld [vmem:[#allocation7 + $0x10] sm:$0xff]   ;;  %v319_v7 = vsub.s32 0, %v318_v6  ;;  %v327_v8 = vsub.s32 2, %v318_v6  ;;  %v323_v10 = vsub.s32 1, %v318_v6  ;;  %s2024_s23 = scalar_lea.hbm %s2075_s5, %s1310_s15 }
  0x78   : > { %v1518_v36 = vld [vmem:[#allocation7] sm:$0xff]   ;;  %v1522_v40 = vld [vmem:[#allocation7 + $0x8] sm:$0xff]   ;;  %v1528_v46 = vld [vmem:[#allocation7 + $0x90] sm:$0xff]   ;;  %v331_v11 = vsub.s32 3, %v318_v6  ;;  %s1117_s7 = scalar_lea.sflag [#allocation4], %s1926_s17  ;;  %s1635_s6 = scalar_lea.vmem %s2018_s14, 1024 }
  0x79   : > { %528 = vmatpush1.bf16.msra.mxu0 %v1487_v15  ;;  %601 = vmatpush1.bf16.msra.mxu1 %v1488_v16  ;;  %v1520_v37 = vld [vmem:[#allocation7 + $0x80] sm:$0xff]   ;;  %v1524_v41 = vld [vmem:[#allocation7 + $0x88] sm:$0xff]   ;;  %v1529_v47 = vld [vmem:[#allocation7 + $0x58] sm:$0xff]   ;;  %p1636_p11 = scmp.ne.s32.totalorder %s2018_s14, %s1635_s6  ;;  %p2089_p0 = scmp.ne.s32.totalorder %s2084_s29, 0 }
  0x7a   : > { %529 = vmatprep.subr.bf16.mxu0 %v1489_v17  ;;  %602 = vmatprep.subr.bf16.mxu1 %v1491_v18  ;;  %v1514_v42 = vld [vmem:[%s1930_s9 + $0x8] sm:$0xff]   ;;  %v1531_v48 = vld [vmem:[#allocation7 + $0xd8] sm:$0xff]   ;;  %v1515_v51 = vld [vmem:[%s1930_s9 + $0x10] sm:$0xff]   ;;  %s1715_s22 = smov [#allocation8]  }
  0x7b   : > { %v1530_v49 = vld [vmem:[#allocation7 + $0x18] sm:$0xff]   ;;  %v1533_v52 = vld [vmem:[#allocation7 + $0x60] sm:$0xff]   ;;  %v1537_v56 = vld [vmem:[#allocation7 + $0x68] sm:$0xff]   ;;  %p1637_p1 = pnand %p1636_p11, %p2089_p0  ;;  %s1639_s8 = sshll.u32 %s1715_s22, 4  ;;  %s1640_s8 = int_to_ptr.vmem [resolvable:$false] %s1639_s8 }
  0x7c   : > { %v1532_v50 = vld [vmem:[#allocation7 + $0x98] sm:$0xff]   ;;  %v1535_v53 = vld [vmem:[#allocation7 + $0xe0] sm:$0xff]   ;;  %v1539_v57 = vld [vmem:[#allocation7 + $0xe8] sm:$0xff]   ;;  %p1642_p5 = scmp.lt.s32.totalorder %s2018_s14, %s1640_s8 }
  0x7d   : > { %530 = vmatpush1.bf16.msra.mxu0 %v1493_v19  ;;  %603 = vmatpush1.bf16.msra.mxu1 %v1494_v20  ;;  %v1534_v54 = vld [vmem:[#allocation7 + $0x20] sm:$0xff]   ;;  %v1538_v58 = vld [vmem:[#allocation7 + $0x28] sm:$0xff]   ;;  %v1516_v59 = vld [vmem:[%s1930_s9 + $0x18] sm:$0xff]   ;;  %p1638_p3 = pneg %p1637_p1  ;;  %s1641_s9 = scalar_lea.vmem %s1640_s8, 2048 }
  0x7e   : > { %531 = vmatprep.subr.bf16.mxu0 %v1495_v21  ;;  %604 = vmatprep.subr.bf16.mxu1 %v1497_v22  ;;  %v1536_v55 = vld [vmem:[#allocation7 + $0xa0] sm:$0xff]   ;;  %v1540_v60 = vld [vmem:[#allocation7 + $0xa8] sm:$0xff]   ;;  %v1541_v61 = vld [vmem:[#allocation7 + $0x70] sm:$0xff]   ;;  %p1643_p9 = scmp.lt.s32.totalorder %s1641_s9, %s1635_s6 }
  0x7f   : > { %v1543_v62 = vld [vmem:[#allocation7 + $0xf0] sm:$0xff]   ;;  %v1545_v2 = vld [vmem:[#allocation7 + $0x78] sm:$0xff]   ;;  %v315_v9 = vld [vmem:[%s2072_s2] sm:$0xf] }
  0x80   : > { %v1542_v63 = vld [vmem:[#allocation7 + $0x30] sm:$0xff]   ;;  %v1546_v3 = vld [vmem:[#allocation7 + $0x38] sm:$0xff]   ;;  %v1955_v12 = vrot.slane %v315_v9, %v319_v7  ;;  %v1957_v13 = vrot.slane %v315_v9, %v327_v8  ;;  %v1959_v14 = vrot.slane %v315_v9, %v323_v10  ;;  %v1961_v15 = vrot.slane %v315_v9, %v331_v11  ;;  %p1644_p12 = por %p1643_p9, %p1642_p5 }
  0x81   : > { %532 = vmatpush1.bf16.msra.mxu0 %v1499_v23  ;;  %605 = vmatpush1.bf16.msra.mxu1 %v1500_v24  ;;  %v1544_v1 = vld [vmem:[#allocation7 + $0xb0] sm:$0xff]   ;;  %v1548_v4 = vld [vmem:[#allocation7 + $0xb8] sm:$0xff]  }
  0x82   : > { %533 = vmatprep.subr.bf16.mxu0 %v1501_v25  ;;  %606 = vmatprep.subr.bf16.mxu1 %v1503_v26  ;;  %p1645_p2 = pnand %p1644_p12, %p1638_p3 }
  0x85   : > { %534 = vmatpush1.bf16.msra.mxu0 %v1505_v27  ;;  %607 = vmatpush1.bf16.msra.mxu1 %v1506_v28 }
  0x86   : > { %535 = vmatprep.subr.bf16.mxu0 %v1507_v29  ;;  %608 = vmatprep.subr.bf16.mxu1 %v1509_v30 }
  0x89   : > { %536 = vmatpush1.bf16.msra.mxu0 %v1511_v31  ;;  %609 = vmatpush1.bf16.msra.mxu1 %v1512_v32 }
  0x8a   : > { %1311 = vmatprep.subr.bf16.mxu0 %v1517_v33  ;;  %1351 = vmatprep.subr.bf16.mxu1 %v1519_v34 }
  0x8c   : > { %554 = vmatmul.mubr.bf16.vlgmr.msra.gmra.mrb[0].mxu0 %v1513_v35  ;;  %627 = vmatmul.mubr.bf16.vlgmr.msra.gmra.mrb[0].mxu1 %v1513_v35 }
  0x8d   : > { %563 = vmatprep.mubr.bf16.mxu0 %v1714_v0  ;;  %636 = vmatprep.mubr.bf16.mxu1 %v1714_v0 }
  0x8e   : > { %1312 = vmatpush3.bf16.msra.mxu0 %v1518_v36  ;;  %1352 = vmatpush3.bf16.msra.mxu1 %v1520_v37 }
  0x8f   : > { %1313 = vmatprep.subr.bf16.mxu0 %v1521_v38  ;;  %1353 = vmatprep.subr.bf16.mxu1 %v1523_v39 }
  0x92   : > { %1314 = vmatpush3.bf16.msra.mxu0 %v1522_v40  ;;  %1354 = vmatpush3.bf16.msra.mxu1 %v1524_v41 }
  0x93   : > { %1315 = vmatprep.subr.bf16.mxu0 %v1525_v43  ;;  %1355 = vmatprep.subr.bf16.mxu1 %v1527_v44 }
  0x94   : > { %564 = vmatmul.mubr.bf16.gmra.mrb[4].mxu0 %v1514_v42  ;;  %637 = vmatmul.mubr.bf16.gmra.mrb[4].mxu1 %v1514_v42 }
  0x95   : > { %573 = vmatprep.mubr.bf16.mxu0 %v1714_v0  ;;  %646 = vmatprep.mubr.bf16.mxu1 %v1714_v0 }
  0x96   : > { %1316 = vmatpush3.bf16.msra.mxu0 %v1526_v45  ;;  %1356 = vmatpush3.bf16.msra.mxu1 %v1528_v46 }
  0x97   : > { %1317 = vmatprep.subr.bf16.mxu0 %v1529_v47  ;;  %1357 = vmatprep.subr.bf16.mxu1 %v1531_v48 }
  0x9a   : > { %1318 = vmatpush3.bf16.msra.mxu0 %v1530_v49  ;;  %1358 = vmatpush3.bf16.msra.mxu1 %v1532_v50 }
  0x9b   : > { %1319 = vmatprep.subr.bf16.mxu0 %v1533_v52  ;;  %1359 = vmatprep.subr.bf16.mxu1 %v1535_v53 }
  0x9c   : > { %574 = vmatmul.mubr.bf16.gmra.mrb[8].mxu0 %v1515_v51  ;;  %647 = vmatmul.mubr.bf16.gmra.mrb[8].mxu1 %v1515_v51 }
  0x9d   : > { %583 = vmatprep.mubr.bf16.mxu0 %v1714_v0  ;;  %656 = vmatprep.mubr.bf16.mxu1 %v1714_v0  ;;  %v1547_v0 = vld [vmem:[#allocation7 + $0xf8] sm:$0xff]  }
  0x9e   : > { %1320 = vmatpush3.bf16.msra.mxu0 %v1534_v54  ;;  %1360 = vmatpush3.bf16.msra.mxu1 %v1536_v55 }
  0x9f   : > { %1321 = vmatprep.subr.bf16.mxu0 %v1537_v56  ;;  %1361 = vmatprep.subr.bf16.mxu1 %v1539_v57 }
  0xa2   : > { %1322 = vmatpush3.bf16.msra.mxu0 %v1538_v58  ;;  %1362 = vmatpush3.bf16.msra.mxu1 %v1540_v60 }
  0xa3   : > { %1323 = vmatprep.subr.bf16.mxu0 %v1541_v61  ;;  %1363 = vmatprep.subr.bf16.mxu1 %v1543_v62 }
  0xa4   : > { %584 = vmatmul.mubr.bf16.gmra.mrb[12].mxu0 %v1516_v59  ;;  %657 = vmatmul.mubr.bf16.gmra.mrb[12].mxu1 %v1516_v59 }
  0xa6   : > { %1324 = vmatpush3.bf16.msra.mxu0 %v1542_v63  ;;  %1364 = vmatpush3.bf16.msra.mxu1 %v1544_v1 }
  0xa7   : > { %1325 = vmatprep.subr.bf16.mxu0 %v1545_v2  ;;  %1365 = vmatprep.subr.bf16.mxu1 %v1547_v0 }
  0xaa   : > { %1326 = vmatpush3.bf16.msra.mxu0 %v1546_v3  ;;  %1366 = vmatpush3.bf16.msra.mxu1 %v1548_v4 }
 0x15f   : > { %v555_v16 = vpop.f32.mrb[0].mxu0  ;;  %v628_v17 = vpop.f32.mrb[0].mxu1 }
 0x160   : > { %v556_v18 = vadd.f32 %v555_v16, %v1955_v12  ;;  %v629_v19 = vadd.f32 %v628_v17, %v1957_v13  ;;  %v557_v20 = vpop.f32.mrb[1].mxu0  ;;  %v630_v21 = vpop.f32.mrb[1].mxu1 }
 0x161   : > { %v558_v22 = vadd.f32 %v557_v20, %v1959_v14  ;;  %v631_v23 = vadd.f32 %v630_v21, %v1961_v15  ;;  %v559_v24 = vpop.f32.mrb[2].mxu0  ;;  %v632_v25 = vpop.f32.mrb[2].mxu1 }
 0x162   : > { %v669_v26 = vmax.f32 %v629_v19, 0.0  ;;  %v560_v27 = vadd.f32 %v559_v24, %v1955_v12  ;;  %v633_v28 = vadd.f32 %v632_v25, %v1957_v13  ;;  %v561_v29 = vpop.f32.mrb[3].mxu0  ;;  %v634_v30 = vpop.f32.mrb[3].mxu1  ;;  %v667_v34 = vmax.f32 %v556_v18, 0.0 }
 0x163   : > { %v670_v31 = vmax.f32 %v631_v23, 0.0  ;;  %v562_v32 = vadd.f32 %v561_v29, %v1959_v14  ;;  %v635_v33 = vadd.f32 %v634_v30, %v1961_v15  ;;  %v668_v37 = vmax.f32 %v558_v22, 0.0 }
 0x164   : > { %v671_v35 = vmax.f32 %v560_v27, 0.0  ;;  %v673_v36 = vmax.f32 %v633_v28, 0.0 }
 0x165   : > { %v672_v38 = vmax.f32 %v562_v32, 0.0  ;;  %v674_v39 = vmax.f32 %v635_v33, 0.0 }
 0x166   : > { %v699_v40 = vpack.c.bf16 %v671_v35, %v667_v34  ;;  %v701_v41 = vpack.c.bf16 %v673_v36, %v669_v26 }
 0x167   : > { %v700_v42 = vpack.c.bf16 %v672_v38, %v668_v37  ;;  %v702_v43 = vpack.c.bf16 %v674_v39, %v670_v31  ;;  %v565_v44 = vpop.f32.mrb[4].mxu0  ;;  %v638_v45 = vpop.f32.mrb[4].mxu1 }
 0x168   : > { %v566_v46 = vadd.f32 %v565_v44, %v1955_v12  ;;  %v639_v47 = vadd.f32 %v638_v45, %v1957_v13  ;;  %v567_v48 = vpop.f32.mrb[5].mxu0  ;;  %v640_v49 = vpop.f32.mrb[5].mxu1 }
 0x169   : > { %v568_v50 = vadd.f32 %v567_v48, %v1959_v14  ;;  %v641_v51 = vadd.f32 %v640_v49, %v1961_v15  ;;  %v569_v52 = vpop.f32.mrb[6].mxu0  ;;  %v642_v53 = vpop.f32.mrb[6].mxu1  ;;  %1010 = vmatprep.mubr.bf16.mxu0 %v700_v42  ;;  %1075 = vmatprep.mubr.bf16.mxu1 %v702_v43 }
 0x16a   : > { %v677_v54 = vmax.f32 %v639_v47, 0.0  ;;  %v570_v55 = vadd.f32 %v569_v52, %v1955_v12  ;;  %v643_v56 = vadd.f32 %v642_v53, %v1957_v13  ;;  %v571_v57 = vpop.f32.mrb[7].mxu0  ;;  %v644_v58 = vpop.f32.mrb[7].mxu1  ;;  %1011 = vmatmul.mubr.bf16.vlgmr.msra.gmra.mrb[16].mxu0 %v699_v40  ;;  %1076 = vmatmul.mubr.bf16.vlgmr.msra.gmra.mrb[16].mxu1 %v701_v41  ;;  %v675_v62 = vmax.f32 %v566_v46, 0.0 }
 0x16b   : > { %v678_v59 = vmax.f32 %v641_v51, 0.0  ;;  %v572_v60 = vadd.f32 %v571_v57, %v1959_v14  ;;  %v645_v61 = vadd.f32 %v644_v58, %v1961_v15  ;;  %v676_v2 = vmax.f32 %v568_v50, 0.0 }
 0x16c   : > { %v679_v63 = vmax.f32 %v570_v55, 0.0  ;;  %v681_v1 = vmax.f32 %v643_v56, 0.0 }
 0x16d   : > { %v680_v0 = vmax.f32 %v572_v60, 0.0  ;;  %v682_v3 = vmax.f32 %v645_v61, 0.0 }
 0x16e   : > { %v703_v4 = vpack.c.bf16 %v679_v63, %v675_v62  ;;  %v705_v5 = vpack.c.bf16 %v681_v1, %v677_v54 }
 0x16f   : > { %v704_v6 = vpack.c.bf16 %v680_v0, %v676_v2  ;;  %v706_v7 = vpack.c.bf16 %v682_v3, %v678_v59  ;;  %v575_v8 = vpop.f32.mrb[8].mxu0  ;;  %v648_v9 = vpop.f32.mrb[8].mxu1 }
 0x170   : > { %v576_v10 = vadd.f32 %v575_v8, %v1955_v12  ;;  %v649_v11 = vadd.f32 %v648_v9, %v1957_v13  ;;  %v577_v16 = vpop.f32.mrb[9].mxu0  ;;  %v650_v17 = vpop.f32.mrb[9].mxu1 }
 0x171   : > { %v578_v18 = vadd.f32 %v577_v16, %v1959_v14  ;;  %v651_v19 = vadd.f32 %v650_v17, %v1961_v15  ;;  %v579_v20 = vpop.f32.mrb[10].mxu0  ;;  %v652_v21 = vpop.f32.mrb[10].mxu1  ;;  %1018 = vmatprep.mubr.bf16.mxu0 %v704_v6  ;;  %1083 = vmatprep.mubr.bf16.mxu1 %v706_v7 }
 0x172   : > { %v685_v22 = vmax.f32 %v649_v11, 0.0  ;;  %v580_v23 = vadd.f32 %v579_v20, %v1955_v12  ;;  %v653_v24 = vadd.f32 %v652_v21, %v1957_v13  ;;  %v581_v25 = vpop.f32.mrb[11].mxu0  ;;  %v654_v26 = vpop.f32.mrb[11].mxu1  ;;  %1019 = vmatmul.mubr.bf16.gmra.mrb[20].mxu0 %v703_v4  ;;  %1084 = vmatmul.mubr.bf16.gmra.mrb[20].mxu1 %v705_v5  ;;  %v683_v30 = vmax.f32 %v576_v10, 0.0 }
 0x173   : > { %v686_v27 = vmax.f32 %v651_v19, 0.0  ;;  %v582_v28 = vadd.f32 %v581_v25, %v1959_v14  ;;  %v655_v29 = vadd.f32 %v654_v26, %v1961_v15  ;;  %v684_v33 = vmax.f32 %v578_v18, 0.0 }
 0x174   : > { %v687_v31 = vmax.f32 %v580_v23, 0.0  ;;  %v689_v32 = vmax.f32 %v653_v24, 0.0 }
 0x175   : > { %v688_v34 = vmax.f32 %v582_v28, 0.0  ;;  %v690_v35 = vmax.f32 %v655_v29, 0.0 }
 0x176   : > { %v707_v36 = vpack.c.bf16 %v687_v31, %v683_v30  ;;  %v709_v37 = vpack.c.bf16 %v689_v32, %v685_v22 }
 0x177   : > { %v708_v38 = vpack.c.bf16 %v688_v34, %v684_v33  ;;  %v710_v39 = vpack.c.bf16 %v690_v35, %v686_v27  ;;  %v585_v40 = vpop.f32.mrb[12].mxu0  ;;  %v658_v41 = vpop.f32.mrb[12].mxu1 }
 0x178   : > { %v586_v42 = vadd.f32 %v585_v40, %v1955_v12  ;;  %v659_v43 = vadd.f32 %v658_v41, %v1957_v13  ;;  %v587_v44 = vpop.f32.mrb[13].mxu0  ;;  %v660_v45 = vpop.f32.mrb[13].mxu1 }
 0x179   : > { %v588_v46 = vadd.f32 %v587_v44, %v1959_v14  ;;  %v661_v47 = vadd.f32 %v660_v45, %v1961_v15  ;;  %v589_v48 = vpop.f32.mrb[14].mxu0  ;;  %v662_v49 = vpop.f32.mrb[14].mxu1  ;;  %1026 = vmatprep.mubr.bf16.mxu0 %v708_v38  ;;  %1091 = vmatprep.mubr.bf16.mxu1 %v710_v39 }
 0x17a   : > { %v693_v50 = vmax.f32 %v659_v43, 0.0  ;;  %v590_v51 = vadd.f32 %v589_v48, %v1955_v12  ;;  %v663_v52 = vadd.f32 %v662_v49, %v1957_v13  ;;  %v591_v53 = vpop.f32.mrb[15].mxu0  ;;  %v664_v54 = vpop.f32.mrb[15].mxu1  ;;  %1027 = vmatmul.mubr.bf16.gmra.mrb[24].mxu0 %v707_v36  ;;  %1092 = vmatmul.mubr.bf16.gmra.mrb[24].mxu1 %v709_v37  ;;  %v691_v58 = vmax.f32 %v586_v42, 0.0 }
 0x17b   : > { %v694_v55 = vmax.f32 %v661_v47, 0.0  ;;  %v592_v56 = vadd.f32 %v591_v53, %v1959_v14  ;;  %v665_v57 = vadd.f32 %v664_v54, %v1961_v15  ;;  %v692_v61 = vmax.f32 %v588_v46, 0.0  ;;  %v1998_v14 = vld [vmem:[%s2074_s4] ss:$0 sm:$0xff] }
 0x17c   : > { %v695_v59 = vmax.f32 %v590_v51, 0.0  ;;  %v697_v60 = vmax.f32 %v663_v52, 0.0 }
 0x17d   : > { %v696_v62 = vmax.f32 %v592_v56, 0.0  ;;  %v698_v63 = vmax.f32 %v665_v57, 0.0 }
 0x17e   : > { %v711_v1 = vpack.c.bf16 %v695_v59, %v691_v58  ;;  %v713_v12 = vpack.c.bf16 %v697_v60, %v693_v50 }
 0x17f   : > { %v712_v2 = vpack.c.bf16 %v696_v62, %v692_v61  ;;  %v714_v13 = vpack.c.bf16 %v698_v63, %v694_v55 }
 0x181   : > { %1034 = vmatprep.mubr.bf16.mxu0 %v712_v2  ;;  %1099 = vmatprep.mubr.bf16.mxu1 %v714_v13 }
 0x182   : > { %1035 = vmatmul.mubr.bf16.gmra.mrb[28].mxu0 %v711_v1  ;;  %1100 = vmatmul.mubr.bf16.gmra.mrb[28].mxu1 %v713_v12 }
 0x23d   : > { %v1327_v0 = vpop.f32.mrb[16].mxu0  ;;  %v1367_v3 = vpop.f32.mrb[16].mxu1 }
 0x23e   : > { %v1328_v15 = vpop.f32.mrb[17].mxu0  ;;  %v1368_v4 = vpop.f32.mrb[17].mxu1 }
 0x23f   : > { %v1329_v5 = vadd.f32 %v1328_v15, %v1327_v0  ;;  %v1369_v6 = vadd.f32 %v1368_v4, %v1367_v3  ;;  %v1330_v7 = vpop.f32.mrb[18].mxu0  ;;  %v1370_v8 = vpop.f32.mrb[18].mxu1 }
 0x240   : > { %v1331_v9 = vpop.f32.mrb[19].mxu0  ;;  %v1371_v10 = vpop.f32.mrb[19].mxu1 }
 0x241   : > { %v1013_v11 = vadd.f32 %v1329_v5, %v1998_v14  ;;  %v1332_v16 = vadd.f32 %v1331_v9, %v1330_v7  ;;  %v1372_v17 = vadd.f32 %v1371_v10, %v1370_v8 }
 0x243   : > { %v1078_v18 = vadd.f32 %v1369_v6, %v1013_v11  ;;  %v1016_v19 = vadd.f32 %v1332_v16, %v1998_v14 }
 0x245   : > { %1108 = vst [vmem:[%s2003_s28] sm:$0xff] %v1078_v18  ;;  %v1081_v20 = vadd.f32 %v1372_v17, %v1016_v19  ;;  %v1333_v21 = vpop.f32.mrb[20].mxu0  ;;  %v1373_v22 = vpop.f32.mrb[20].mxu1 }
 0x246   : > { %v1334_v23 = vpop.f32.mrb[21].mxu0  ;;  %v1374_v24 = vpop.f32.mrb[21].mxu1 }
 0x247   : > { %1109 = vst [vmem:[%s2003_s28 + $0x8] sm:$0xff] %v1081_v20  ;;  %v1335_v25 = vadd.f32 %v1334_v23, %v1333_v21  ;;  %v1375_v26 = vadd.f32 %v1374_v24, %v1373_v22  ;;  %v1336_v27 = vpop.f32.mrb[22].mxu0  ;;  %v1376_v28 = vpop.f32.mrb[22].mxu1 }
 0x248   : > { %v1337_v29 = vpop.f32.mrb[23].mxu0  ;;  %v1377_v30 = vpop.f32.mrb[23].mxu1 }
 0x249   : > { %v1021_v31 = vadd.f32 %v1335_v25, %v1998_v14  ;;  %v1338_v32 = vadd.f32 %v1337_v29, %v1336_v27  ;;  %v1378_v33 = vadd.f32 %v1377_v30, %v1376_v28 }
 0x24b   : > { %v1086_v34 = vadd.f32 %v1375_v26, %v1021_v31  ;;  %v1024_v35 = vadd.f32 %v1338_v32, %v1998_v14 }
 0x24d   : > { %1110 = vst [vmem:[%s2003_s28 + $0x10] sm:$0xff] %v1086_v34  ;;  %v1089_v36 = vadd.f32 %v1378_v33, %v1024_v35  ;;  %v1339_v37 = vpop.f32.mrb[24].mxu0  ;;  %v1379_v38 = vpop.f32.mrb[24].mxu1 }
 0x24e   : > { %v1340_v39 = vpop.f32.mrb[25].mxu0  ;;  %v1380_v40 = vpop.f32.mrb[25].mxu1 }
 0x24f   : > { %1111 = vst [vmem:[%s2003_s28 + $0x18] sm:$0xff] %v1089_v36  ;;  %v1341_v41 = vadd.f32 %v1340_v39, %v1339_v37  ;;  %v1381_v42 = vadd.f32 %v1380_v40, %v1379_v38  ;;  %v1342_v43 = vpop.f32.mrb[26].mxu0  ;;  %v1382_v44 = vpop.f32.mrb[26].mxu1 }
 0x250   : > { %v1343_v45 = vpop.f32.mrb[27].mxu0  ;;  %v1383_v46 = vpop.f32.mrb[27].mxu1 }
 0x251   : > { %v1029_v47 = vadd.f32 %v1341_v41, %v1998_v14  ;;  %v1344_v48 = vadd.f32 %v1343_v45, %v1342_v43  ;;  %v1384_v49 = vadd.f32 %v1383_v46, %v1382_v44 }
 0x253   : > { %v1094_v50 = vadd.f32 %v1381_v42, %v1029_v47  ;;  %v1032_v51 = vadd.f32 %v1344_v48, %v1998_v14 }
 0x255   : > { %1112 = vst [vmem:[%s2003_s28 + $0x20] sm:$0xff] %v1094_v50  ;;  %v1097_v52 = vadd.f32 %v1384_v49, %v1032_v51  ;;  %v1345_v53 = vpop.f32.mrb[28].mxu0  ;;  %v1385_v54 = vpop.f32.mrb[28].mxu1 }
 0x256   : > { %v1346_v55 = vpop.f32.mrb[29].mxu0  ;;  %v1386_v56 = vpop.f32.mrb[29].mxu1 }
 0x257   : > { %1113 = vst [vmem:[%s2003_s28 + $0x28] sm:$0xff] %v1097_v52  ;;  %v1347_v57 = vadd.f32 %v1346_v55, %v1345_v53  ;;  %v1387_v58 = vadd.f32 %v1386_v56, %v1385_v54  ;;  %v1348_v59 = vpop.f32.mrb[30].mxu0  ;;  %v1388_v60 = vpop.f32.mrb[30].mxu1 }
 0x258   : > { %v1349_v61 = vpop.f32.mrb[31].mxu0  ;;  %v1389_v62 = vpop.f32.mrb[31].mxu1 }
 0x259   : > { %v1037_v63 = vadd.f32 %v1347_v57, %v1998_v14  ;;  %v1350_v1 = vadd.f32 %v1349_v61, %v1348_v59  ;;  %v1390_v12 = vadd.f32 %v1389_v62, %v1388_v60 }
 0x25b   : > { %v1102_v2 = vadd.f32 %v1387_v58, %v1037_v63  ;;  %v1040_v13 = vadd.f32 %v1350_v1, %v1998_v14 }
 0x25d   : > { %1114 = vst [vmem:[%s2003_s28 + $0x30] sm:$0xff] %v1102_v2  ;;  %v1105_v0 = vadd.f32 %v1390_v12, %v1040_v13 }
 0x25f   : > { %1115 = vst [vmem:[%s2003_s28 + $0x38] sm:$0xff] %v1105_v0 }
 0x260   : > { %1648 = shalt.err (!%p1645_p2)
}
 0x261   : > { %s1649_s24 = scalar_lea.hbm %s2024_s23, 1024  ;;  %s1653_s13 = scalar_lea.hbm %s2075_s5, 2048 }
 0x262   : > { %p1650_p13 = scmp.ne.s32.totalorder %s2024_s23, %s1649_s24  ;;  %p1654_p4 = scmp.lt.u32.totalorder %s2024_s23, %s2075_s5 }
 0x263   : > { %p1655_p7 = scmp.lt.u32.totalorder %s1653_s13, %s1649_s24  ;;  %p1657_p11 = scmp.lt.u32.totalorder %s1649_s24, %s2024_s23 }
 0x264   : > { %p1651_p6 = pnand %p1650_p13, %p2089_p0 }
 0x265   : > { %p1656_p8 = por %p1655_p7, %p1654_p4 }
 0x266   : > { %p1652_p10 = pneg %p1651_p6 }
 0x267   : > { %p1658_p1 = por %p1657_p11, %p1656_p8 }
 0x269   : > { %p1659_p3 = pnand %p1658_p1, %p1652_p10 }
 0x26b   : > { %1662 = shalt.err (!%p1659_p3)
}
 0x26c   : > { %s1716_s15 = smov 128   ;;  %s1717_s30 = smov 8  }
 0x26d   : > { %1401 = dma.vmem_to_hbm [thread:$0]  (%p2089_p0), %s2018_s14, 1024, %s2024_s23, %s1117_s7, %s1716_s15, %s1716_s15, %s1717_s30  }
 0x26e PF: > { %s1145_s11 = sand.u32 1, %s1693_s18   ;;  %p2090_p5 = scmp.ne.s32.totalorder %s2080_s25, 0 }
 0x26f   : > { %p2091_p9 = scmp.ge.s32.totalorder %s1705_s21, 2  ;;  %s1146_s6 = scalar_lea.sflag [#allocation4], %s1145_s11 }
 0x271   : > { %p1415_p12 = pnand %p2091_p9, %p2090_p5 }
 0x273   : > { %1688 = dma.done.wait (!%p1415_p12), %s1146_s6, 1024  }
 0x274   : > { %1690 = vsyncadd (!%p1415_p12), %s1146_s6, 4294966272  ;;  %p19_p2 = scmp.ge.s32.totalorder %s1861_s16, 4   ;;  %s2092_s18 = smov %s1697_s19 }
 0x275   : > { %s2093_s19 = smov %s1701_s20  ;;  %s2094_s20 = smov %s1870_s27 }
 0x276   : > { %s2095_s21 = smov %s1861_s16  ;;  %21 = sbr.rel (!%p19_p2) target bundleno = 6 (0x6), region = 93 }
 0x27d   :  { %1151 = vsyncpa [#allocation3], 1 }
 0x27e   :  { %1153 = vsyncpa [#allocation3 + $0x1], 1 }
 0x27f   :  { %1154 = vsyncpa [#allocation6], 1 }
 0x280   :  { %1155 = vsyncpa [#allocation4], 1 }
 0x281   :  { %1157 = vsyncpa [#allocation4 + $0x1], 1 }

</bundles_post_ra>
